<compile_context>
chip_gen: v6e
topology: v6e:2x2x1
jax: 0.10.0
libtpu: 0.0.40
codegen_flags: <defaults>
</compile_context>

<pallas_src>
import jax
import jax.numpy as jnp
from jax import lax
from jax.experimental import pallas as pl
from jax.experimental.pallas import tpu as pltpu

# ---- Module hyper-parameters (from TravelNet.py) ---------------------------
HIDDEN_SIZE = 9
NUM_CLASSES = 24
SEQ_LEN = 8            # small seq length for the synthetic example
INPUT_SIZE = 7         # X.shape[-1]
OUTPUT_SIZE_CONT = 21  # 10 tripstart + 10 tripend + 1 distance
OUTPUT_SIZE_CAT = 6    # y_cat.shape[2]

# Packed-parameter layout (built once in pack_params):
#   ps: (25, 10)  "small" params
#     rows 0:7,   cols 0:9 -> W_ih^T                       (7, 9)
#     row  7,     cols 0:9 -> b_ih + b_hh                  (9,)
#     rows 8:17,  cols 0:9 -> W_hh^T                       (9, 9)
#     rows 17:25, cols 0:9 -> W_cat padded to 8 rows (rows 18..23 hold W_cat)
#     rows 17:25, col  9   -> b_cat padded          (rows 18..23 hold b_cat)
#   ph: (10, 128) lane-dense continuous head
#     rows 0:9, cols 0:21 -> W_cont^T ; row 9, cols 0:21 -> b_cont ; rest 0
#
# Output block layout (8, 128):
#   row 0,    lanes 0:21 -> clamped [tripstart(10) | tripend(10) | distance(1)]
#   rows 1:7, lanes 0:24 -> purpose (row i = categorical logit i-1, broadcast)


def travelnet_kernel(x_ref, ps_ref, ph_ref, out_ref):
    # Load (tiny) packed params once and slice views (all static slices).
    ps = ps_ref[...]                                            # (25, 10)
    w_ih_t = ps[0:INPUT_SIZE, 0:HIDDEN_SIZE]                    # (7, 9)
    b_rnn = ps[INPUT_SIZE:INPUT_SIZE + 1, 0:HIDDEN_SIZE]        # (1, 9) = b_ih+b_hh
    w_hh_t = ps[8:8 + HIDDEN_SIZE, 0:HIDDEN_SIZE]               # (9, 9)
    w_cat_pad = ps[17:25, 0:HIDDEN_SIZE]                        # (8, 9)
    b_cat_col = ps[17:25, HIDDEN_SIZE:HIDDEN_SIZE + 1]          # (8, 1)

    ph = ph_ref[...]                                            # (10, 128)
    w_head = ph[0:HIDDEN_SIZE, :]                               # (9, 128)
    b_head = ph[HIDDEN_SIZE:HIDDEN_SIZE + 1, :]                 # (1, 128)

    # Hoisted input projection for all timesteps (biases pre-folded).
    x = x_ref[...]                                              # (T, 7)
    pre = jnp.dot(x, w_ih_t, preferred_element_type=jnp.float32) + b_rnn  # (T, 9)

    # Elman recurrence h_t = tanh(pre_t + h_{t-1} @ W_hh^T), fully unrolled.
    h = jnp.zeros((1, HIDDEN_SIZE), jnp.float32)
    for t in range(x_ref.shape[0]):                             # static unroll (T=8)
        h = jnp.tanh(pre[t:t + 1, :] +
                     jnp.dot(h, w_hh_t, preferred_element_type=jnp.float32))

    # Continuous head, lane-dense: (1,9)@(9,128) -> (1,128); lanes >= 21 stay 0.
    cont = jnp.dot(h, w_head, preferred_element_type=jnp.float32) + b_head

    # Clamps: lanes 0..19 (tripstart|tripend) -> [0,1]; lane 20 (dist) -> [0,inf).
    lane = lax.broadcasted_iota(jnp.int32, (1, 128), 1)
    row0 = jnp.maximum(cont, 0.0)
    row0 = jnp.where(lane < 20, jnp.minimum(row0, 1.0), row0)   # (1, 128)

    # Categorical head in column layout: VPU multiply + lane reduce -> (8, 1).
    cat_col = jnp.sum(w_cat_pad * h, axis=1, keepdims=True) + b_cat_col

    # Assemble the single lane-dense output block:
    #   row 0 = clamped continuous outputs, rows 1..6 = purpose (lane broadcast
    #   of each categorical logit == the 24-way class broadcast), row 7 = 0.
    rows = lax.broadcasted_iota(jnp.int32, (8, 128), 0)
    out_ref[...] = jnp.where(rows == 0,
                             jnp.broadcast_to(row0, (8, 128)),
                             jnp.broadcast_to(cat_col, (8, 128)))


def pack_params(p):
    """Pre-transpose / fold / pad the 9 PyTorch-convention params into 2 arrays."""
    ps = jnp.zeros((25, 10), jnp.float32)
    ps = ps.at[0:INPUT_SIZE, 0:HIDDEN_SIZE].set(p["w_ih"].T)
    ps = ps.at[INPUT_SIZE, 0:HIDDEN_SIZE].set(
        (p["b_ih"] + p["b_hh"]).reshape(HIDDEN_SIZE))
    ps = ps.at[8:8 + HIDDEN_SIZE, 0:HIDDEN_SIZE].set(p["w_hh"].T)
    ps = ps.at[18:18 + OUTPUT_SIZE_CAT, 0:HIDDEN_SIZE].set(p["w_cat"])
    ps = ps.at[18:18 + OUTPUT_SIZE_CAT, HIDDEN_SIZE].set(
        p["b_cat"].reshape(OUTPUT_SIZE_CAT))

    ph = jnp.zeros((10, 128), jnp.float32)
    ph = ph.at[0:HIDDEN_SIZE, 0:OUTPUT_SIZE_CONT].set(p["w_cont"].T)
    ph = ph.at[HIDDEN_SIZE, 0:OUTPUT_SIZE_CONT].set(
        p["b_cont"].reshape(OUTPUT_SIZE_CONT))
    return ps, ph


@jax.jit
def travelnet_forward(x, ps, ph):
    """x: (seq_len, 1, INPUT_SIZE) float32; ps/ph: packed params."""
    x2d = x[:, 0, :].astype(jnp.float32)        # squeeze batch -> (seq, INPUT_SIZE)

    vmem = pl.BlockSpec(memory_space=pltpu.MemorySpace.VMEM)
    out = pl.pallas_call(
        travelnet_kernel,
        out_shape=jax.ShapeDtypeStruct((8, 128), jnp.float32),
        in_specs=[vmem, vmem, vmem],
        out_specs=vmem,
    )(x2d, ps, ph)

    # Slice the packed output block back into PyTorch-shaped results
    # (pure layout plumbing; all compute happened in the kernel).
    ts = out[0, 0:10]                                   # (10,)
    te = out[0, 10:20]                                  # (10,)
    dist = out[0, 20:21]                                # (1,)
    purpose = out[1:1 + OUTPUT_SIZE_CAT, 0:NUM_CLASSES]  # (6, 24)
    return ts, te, dist, purpose


def make_params(key):
    ks = jax.random.split(key, 8)
    scale = 1.0 / jnp.sqrt(HIDDEN_SIZE)
    u = lambda k, shape: jax.random.uniform(k, shape, jnp.float32, -scale, scale)
    return {
        "w_ih":  u(ks[0], (HIDDEN_SIZE, INPUT_SIZE)),
        "w_hh":  u(ks[1], (HIDDEN_SIZE, HIDDEN_SIZE)),
        "b_ih":  u(ks[2], (1, HIDDEN_SIZE)),
        "b_hh":  u(ks[3], (1, HIDDEN_SIZE)),
        "w_cont": u(ks[4], (OUTPUT_SIZE_CONT, HIDDEN_SIZE)),
        "b_cont": u(ks[5], (1, OUTPUT_SIZE_CONT)),
        "w_cat":  u(ks[6], (OUTPUT_SIZE_CAT, HIDDEN_SIZE)),
        "b_cat":  u(ks[7], (1, OUTPUT_SIZE_CAT)),
    }


def reference_forward(x, p):
    """Pure-JAX reference mirroring the PyTorch semantics (for verification)."""
    h = jnp.zeros((1, HIDDEN_SIZE), jnp.float32)
    for t in range(x.shape[0]):
        x_t = x[t]                                   # (1, I)
        h = jnp.tanh(x_t @ p["w_ih"].T + p["b_ih"] + h @ p["w_hh"].T + p["b_hh"])
    cont = (h @ p["w_cont"].T + p["b_cont"])[0]      # (21,)
    cat = (h @ p["w_cat"].T + p["b_cat"])[0]         # (C_cat,)
    ts = jnp.clip(cont[:10], 0.0, 1.0)
    te = jnp.clip(cont[10:20], 0.0, 1.0)
    dist = jnp.maximum(cont[20:], 0.0)
    purpose = jnp.broadcast_to(cat[:, None], (OUTPUT_SIZE_CAT, NUM_CLASSES))
    return ts, te, dist, purpose


if __name__ == "__main__":
    key = jax.random.PRNGKey(0)
    k_x, k_p = jax.random.split(key)
    X = jax.random.normal(k_x, (SEQ_LEN, 1, INPUT_SIZE), jnp.float32)
    params = make_params(k_p)
    ps, ph = pack_params(params)   # done once, outside the hot path

    outs = travelnet_forward(X, ps, ph)
    outs = jax.block_until_ready(outs)

    refs = reference_forward(X, params)
    for o, r in zip(outs, refs):
        assert o.shape == r.shape, (o.shape, r.shape)
        assert jnp.allclose(o, r, atol=1e-5, rtol=1e-5)

    print("KERNEL_OK")
</pallas_src>

<mosaic_0001>
module attributes {stable_mosaic.version = 11 : i64} {
  func.func @travelnet_kernel(%arg0: memref<8x7xf32, #tpu.memory_space<vmem>>, %arg1: memref<25x10xf32, #tpu.memory_space<vmem>>, %arg2: memref<10x128xf32, #tpu.memory_space<vmem>>, %arg3: memref<8x128xf32, #tpu.memory_space<vmem>>) attributes {dimension_semantics = [], scalar_prefetch = 0 : i64, scratch_operands = 0 : i64, tpu.core_type = #tpu.core_type<tc>} {
    %c0 = arith.constant 0 : index
    %c0_0 = arith.constant 0 : index
    %0 = vector.load %arg1[%c0, %c0_0] : memref<25x10xf32, #tpu.memory_space<vmem>>, vector<25x10xf32>
    %1 = vector.extract_strided_slice %0 {offsets = [0, 0], sizes = [7, 9], strides = [1, 1]} : vector<25x10xf32> to vector<7x9xf32>
    %2 = vector.extract_strided_slice %0 {offsets = [7, 0], sizes = [1, 9], strides = [1, 1]} : vector<25x10xf32> to vector<1x9xf32>
    %3 = vector.extract_strided_slice %0 {offsets = [8, 0], sizes = [9, 9], strides = [1, 1]} : vector<25x10xf32> to vector<9x9xf32>
    %4 = vector.extract_strided_slice %0 {offsets = [17, 0], sizes = [8, 9], strides = [1, 1]} : vector<25x10xf32> to vector<8x9xf32>
    %5 = vector.extract_strided_slice %0 {offsets = [17, 9], sizes = [8, 1], strides = [1, 1]} : vector<25x10xf32> to vector<8x1xf32>
    %c0_1 = arith.constant 0 : index
    %c0_2 = arith.constant 0 : index
    %6 = vector.load %arg2[%c0_1, %c0_2] : memref<10x128xf32, #tpu.memory_space<vmem>>, vector<10x128xf32>
    %7 = vector.extract_strided_slice %6 {offsets = [0, 0], sizes = [9, 128], strides = [1, 1]} : vector<10x128xf32> to vector<9x128xf32>
    %8 = vector.extract_strided_slice %6 {offsets = [9, 0], sizes = [1, 128], strides = [1, 1]} : vector<10x128xf32> to vector<1x128xf32>
    %c0_3 = arith.constant 0 : index
    %c0_4 = arith.constant 0 : index
    %9 = vector.load %arg0[%c0_3, %c0_4] : memref<8x7xf32, #tpu.memory_space<vmem>>, vector<8x7xf32>
    %cst = arith.constant dense<0.000000e+00> : vector<8x9xf32>
    %10 = tpu.matmul %9, %1, %cst {dimension_numbers = #tpu.dot_dimension_numbers<[1], [0], [0], [1], [0, 0, 1, 1], [], []>} : vector<8x7xf32>, vector<7x9xf32>, vector<8x9xf32> -> vector<8x9xf32>
    %11 = vector.broadcast %2 : vector<1x9xf32> to vector<8x9xf32>
    %12 = arith.addf %10, %11 : vector<8x9xf32>
    %cst_5 = arith.constant 0.000000e+00 : f32
    %13 = vector.broadcast %cst_5 : f32 to vector<1x9xf32>
    %14 = vector.extract_strided_slice %12 {offsets = [0, 0], sizes = [1, 9], strides = [1, 1]} : vector<8x9xf32> to vector<1x9xf32>
    %cst_6 = arith.constant dense<0.000000e+00> : vector<1x9xf32>
    %15 = tpu.matmul %13, %3, %cst_6 {dimension_numbers = #tpu.dot_dimension_numbers<[1], [0], [0], [1], [0, 0, 1, 1], [], []>} : vector<1x9xf32>, vector<9x9xf32>, vector<1x9xf32> -> vector<1x9xf32>
    %16 = arith.addf %14, %15 : vector<1x9xf32>
    %17 = math.tanh %16 : vector<1x9xf32>
    %18 = vector.extract_strided_slice %12 {offsets = [1, 0], sizes = [1, 9], strides = [1, 1]} : vector<8x9xf32> to vector<1x9xf32>
    %cst_7 = arith.constant dense<0.000000e+00> : vector<1x9xf32>
    %19 = tpu.matmul %17, %3, %cst_7 {dimension_numbers = #tpu.dot_dimension_numbers<[1], [0], [0], [1], [0, 0, 1, 1], [], []>} : vector<1x9xf32>, vector<9x9xf32>, vector<1x9xf32> -> vector<1x9xf32>
    %20 = arith.addf %18, %19 : vector<1x9xf32>
    %21 = math.tanh %20 : vector<1x9xf32>
    %22 = vector.extract_strided_slice %12 {offsets = [2, 0], sizes = [1, 9], strides = [1, 1]} : vector<8x9xf32> to vector<1x9xf32>
    %cst_8 = arith.constant dense<0.000000e+00> : vector<1x9xf32>
    %23 = tpu.matmul %21, %3, %cst_8 {dimension_numbers = #tpu.dot_dimension_numbers<[1], [0], [0], [1], [0, 0, 1, 1], [], []>} : vector<1x9xf32>, vector<9x9xf32>, vector<1x9xf32> -> vector<1x9xf32>
    %24 = arith.addf %22, %23 : vector<1x9xf32>
    %25 = math.tanh %24 : vector<1x9xf32>
    %26 = vector.extract_strided_slice %12 {offsets = [3, 0], sizes = [1, 9], strides = [1, 1]} : vector<8x9xf32> to vector<1x9xf32>
    %cst_9 = arith.constant dense<0.000000e+00> : vector<1x9xf32>
    %27 = tpu.matmul %25, %3, %cst_9 {dimension_numbers = #tpu.dot_dimension_numbers<[1], [0], [0], [1], [0, 0, 1, 1], [], []>} : vector<1x9xf32>, vector<9x9xf32>, vector<1x9xf32> -> vector<1x9xf32>
    %28 = arith.addf %26, %27 : vector<1x9xf32>
    %29 = math.tanh %28 : vector<1x9xf32>
    %30 = vector.extract_strided_slice %12 {offsets = [4, 0], sizes = [1, 9], strides = [1, 1]} : vector<8x9xf32> to vector<1x9xf32>
    %cst_10 = arith.constant dense<0.000000e+00> : vector<1x9xf32>
    %31 = tpu.matmul %29, %3, %cst_10 {dimension_numbers = #tpu.dot_dimension_numbers<[1], [0], [0], [1], [0, 0, 1, 1], [], []>} : vector<1x9xf32>, vector<9x9xf32>, vector<1x9xf32> -> vector<1x9xf32>
    %32 = arith.addf %30, %31 : vector<1x9xf32>
    %33 = math.tanh %32 : vector<1x9xf32>
    %34 = vector.extract_strided_slice %12 {offsets = [5, 0], sizes = [1, 9], strides = [1, 1]} : vector<8x9xf32> to vector<1x9xf32>
    %cst_11 = arith.constant dense<0.000000e+00> : vector<1x9xf32>
    %35 = tpu.matmul %33, %3, %cst_11 {dimension_numbers = #tpu.dot_dimension_numbers<[1], [0], [0], [1], [0, 0, 1, 1], [], []>} : vector<1x9xf32>, vector<9x9xf32>, vector<1x9xf32> -> vector<1x9xf32>
    %36 = arith.addf %34, %35 : vector<1x9xf32>
    %37 = math.tanh %36 : vector<1x9xf32>
    %38 = vector.extract_strided_slice %12 {offsets = [6, 0], sizes = [1, 9], strides = [1, 1]} : vector<8x9xf32> to vector<1x9xf32>
    %cst_12 = arith.constant dense<0.000000e+00> : vector<1x9xf32>
    %39 = tpu.matmul %37, %3, %cst_12 {dimension_numbers = #tpu.dot_dimension_numbers<[1], [0], [0], [1], [0, 0, 1, 1], [], []>} : vector<1x9xf32>, vector<9x9xf32>, vector<1x9xf32> -> vector<1x9xf32>
    %40 = arith.addf %38, %39 : vector<1x9xf32>
    %41 = math.tanh %40 : vector<1x9xf32>
    %42 = vector.extract_strided_slice %12 {offsets = [7, 0], sizes = [1, 9], strides = [1, 1]} : vector<8x9xf32> to vector<1x9xf32>
    %cst_13 = arith.constant dense<0.000000e+00> : vector<1x9xf32>
    %43 = tpu.matmul %41, %3, %cst_13 {dimension_numbers = #tpu.dot_dimension_numbers<[1], [0], [0], [1], [0, 0, 1, 1], [], []>} : vector<1x9xf32>, vector<9x9xf32>, vector<1x9xf32> -> vector<1x9xf32>
    %44 = arith.addf %42, %43 : vector<1x9xf32>
    %45 = math.tanh %44 : vector<1x9xf32>
    %cst_14 = arith.constant dense<0.000000e+00> : vector<1x128xf32>
    %46 = tpu.matmul %45, %7, %cst_14 {dimension_numbers = #tpu.dot_dimension_numbers<[1], [0], [0], [1], [0, 0, 1, 1], [], []>} : vector<1x9xf32>, vector<9x128xf32>, vector<1x128xf32> -> vector<1x128xf32>
    %47 = arith.addf %46, %8 : vector<1x128xf32>
    %48 = tpu.iota {dimensions = array<i32: 1>} : vector<1x128xi32>
    %cst_15 = arith.constant 0.000000e+00 : f32
    %49 = vector.broadcast %cst_15 : f32 to vector<1x128xf32>
    %50 = arith.maximumf %47, %49 : vector<1x128xf32>
    %c20_i32 = arith.constant 20 : i32
    %51 = vector.broadcast %c20_i32 : i32 to vector<1x128xi32>
    %52 = arith.cmpi slt, %48, %51 : vector<1x128xi32>
    %cst_16 = arith.constant 1.000000e+00 : f32
    %53 = vector.broadcast %cst_16 : f32 to vector<1x128xf32>
    %54 = arith.minimumf %50, %53 : vector<1x128xf32>
    %55 = arith.select %52, %54, %50 : vector<1x128xi1>, vector<1x128xf32>
    %56 = vector.broadcast %45 : vector<1x9xf32> to vector<8x9xf32>
    %57 = arith.mulf %4, %56 : vector<8x9xf32>
    %cst_17 = arith.constant dense<0.000000e+00> : vector<8xf32>
    %58 = vector.multi_reduction <add>, %57, %cst_17 [1] : vector<8x9xf32> to vector<8xf32>
    %59 = vector.shape_cast %58 : vector<8xf32> to vector<8x1xf32>
    %60 = arith.addf %59, %5 : vector<8x1xf32>
    %61 = tpu.iota {dimensions = array<i32: 0>} : vector<8x128xi32>
    %c0_i32 = arith.constant 0 : i32
    %62 = vector.broadcast %c0_i32 : i32 to vector<8x128xi32>
    %63 = arith.cmpi eq, %61, %62 : vector<8x128xi32>
    %64 = vector.shape_cast %55 : vector<1x128xf32> to vector<1x128xf32>
    %65 = vector.broadcast %64 : vector<1x128xf32> to vector<8x128xf32>
    %66 = vector.shape_cast %60 : vector<8x1xf32> to vector<8x1xf32>
    %67 = vector.broadcast %66 : vector<8x1xf32> to vector<8x128xf32>
    %68 = arith.select %63, %65, %67 : vector<8x128xi1>, vector<8x128xf32>
    %c0_18 = arith.constant 0 : index
    %c0_19 = arith.constant 0 : index
    %69 = vector.load %arg3[%c0_18, %c0_19] : memref<8x128xf32, #tpu.memory_space<vmem>>, vector<8x128xf32>
    tpu.vector_store %arg3[%c0_18, %c0_19], %68 {strides = array<i32>} : memref<8x128xf32, #tpu.memory_space<vmem>>, vector<8x128xf32>,
    return
  }
}

</mosaic_0001>

<bundles_post_ra>
// kernel: travelnet_forward.1
= control target key start
LH: loop header
LB: loop body
LE: loop exit
PB: predicated region body
PF: predicated region fallthrough
CT: control target
= control target key end

     0   :  { %vm29_vm0 = vcmask 1046528   ;;  %vm107_vm1 = vcmask 1040384   ;;  %v998_v0 = vmov 0.0   ;;  %vm25_vm2 = vcmask 56320   ;;  %s1147_s1 = inlined_call_operand.vmem [shape: f32[25,10], index: 1, kind: input, shape index: {}]   ;;  %s1148_s0 = inlined_call_operand.vmem [shape: f32[8,7], index: 0, kind: input, shape index: {}]   ;;  %s1149_s2 = inlined_call_operand.vmem [shape: f32[10,128], index: 2, kind: input, shape index: {}]   ;;  %s1150_s3 = inlined_call_operand.vmem [shape: f32[8,128], index: 3, kind: output, shape index: {}]  }
   0x1   :  { %909 = vmatprep.subr.mxu0 %v998_v0  ;;  %914 = vmatprep.subr.mxu1 %v998_v0  ;;  %v14_v1 = vld [vmem:[%s1147_s1] sm:$0xff]  ;;  %v1029_v2 = vld [vmem:[%s1147_s1 + $0x10] sm:$0xff]  ;;  %v1034_v3 = vld [vmem:[%s1147_s1 + $0x8] sm:$0xff]  ;;  %vm999_vm3 = vmmov 0   ;;  %v21_v5 = vlaneseq  ;;  %vm103_vm4 = vcmask 72704   ;;  %vm826_vm5 = vcmask 72705  }
   0x2   :  { %910 = vmatpush3.msk.msra.mxu0 %vm29_vm0, %v14_v1  ;;  %911 = vmatprep.mubr.msk.f32.mxu0 %vm999_vm3, %v998_v0  ;;  %v20_v4 = vld [vmem:[%s1148_s0] sm:$0xff]  ;;  %v19_v52 = vld [vmem:[%s1149_s2 + $0x8] sm:$0x3]  ;;  %v17_v61 = vld [vmem:[%s1147_s1 + $0x18] sm:$0x1]  ;;  %vm830_vm6 = vcmask 65536  }
   0x3   :  { %915 = vmatpush3.msk.msra.mxu1 %vm107_vm1, %v1029_v2  ;;  %912 = vmatmul.mubr.msk.f32.vlgmr.msra.gmra.mxu0 %vm25_vm2, %v20_v4  ;;  %v1066_v6 = vshrl.u32 %v21_v5, 7  ;;  %v18_v53 = vld [vmem:[%s1149_s2] sm:$0xff] }
   0x4   :  { %916 = vmatprep.subr.mxu1 %v998_v0  ;;  %918 = vmatprep.mubr.msk.f32.mxu1 %vm999_vm3, %v998_v0 }
   0x5   :  { %917 = vmatpush3.msra.mxu1 %v1034_v3  ;;  %921 = vmatprep.subr.mxu0 %v998_v0  ;;  %v23_v7 = vsub.s32 7, %v1066_v6  ;;  %vm838_vm8 = vcmp.eq.s32.totalorder %v1066_v6, 0 }
   0x6   :  { %919 = vmatmul.mubr.f32.vlgmr.msra.gmra.mxu1 %v998_v0  ;;  %922 = vmatpush3.msk.msra.mxu0 %vm107_vm1, %v1029_v2 }
   0x7   :  { %923 = vmatprep.subr.mxu0 %v998_v0  ;;  %925 = vmatprep.mubr.msk.f32.mxu0 %vm999_vm3, %v998_v0  ;;  %v24_v8 = vrot.slane %v14_v1, %v23_v7 }
   0x8   :  { %924 = vmatpush3.msra.mxu0 %v1034_v3  ;;  %928 = vmatprep.subr.mxu1 %v998_v0 }
   0x9   :  { %929 = vmatpush3.msk.msra.mxu1 %vm107_vm1, %v1029_v2  ;;  %932 = vmatprep.mubr.msk.f32.mxu1 %vm999_vm3, %v998_v0 }
   0xa   :  { %930 = vmatprep.subr.mxu1 %v998_v0  ;;  %935 = vmatprep.subr.mxu0 %v998_v0 }
   0xb   :  { %931 = vmatpush3.msra.mxu1 %v1034_v3 }
   0xc   :  { %942 = vmatprep.subr.mxu1 %v998_v0 }
  0xc3   :  { %v99_v9 = vpop.f32.mrf.mxu0 }
  0xc4   :  { %v1071_v10 = vadd.f32 %v99_v9, %v24_v8 }
  0xc5   :  { %v913_v11 = vpop.f32.mrf.mxu0 }
  0xc6   :  { %v177_v12 = vpop.f32.mrf.mxu1 }
  0xc7   :  { %v181_v13 = vadd.f32 %v177_v12, %v1071_v10  ;;  %v738_v12 = vrot.slane %v19_v52, 1 }
  0xc8   :  { %v920_v14 = vpop.f32.mrf.mxu1 }
  0xc9   :  { %982 = vtanh.f32 %v181_v13 }
  0xd6   :  { %v983_v15 = vpop.eup %982 }
  0xd7   :  { %926 = vmatmul.mubr.msk.f32.vlgmr.msra.gmra.mxu0 %vm103_vm4, %v983_v15  ;;  %v815_v15 = vand.u32 127, %v21_v5 }
  0xd8   :  { %936 = vmatpush3.msk.msra.mxu0 %vm107_vm1, %v1029_v2  ;;  %939 = vmatprep.mubr.msk.f32.mxu0 %vm999_vm3, %v998_v0 }
  0xd9   :  { %937 = vmatprep.subr.mxu0 %v998_v0  ;;  %vm817_vm7 = vcmp.lt.s32.totalorder %v815_v15, 20 }
  0xda   :  { %938 = vmatpush3.msra.mxu0 %v1034_v3 }
  0xdb   :  { %949 = vmatprep.subr.mxu0 %v998_v0 }
 0x197   :  { %v252_v16 = vpop.f32.mrf.mxu0 }
 0x198   :  { %v257_v17 = vrot.slane %v252_v16, 7 }
 0x199   :  { %v927_v18 = vpop.f32.mrf.mxu0 }
 0x19a   :  { %v259_v19 = vadd.f32 %v257_v17, %v1071_v10  ;;  %v841_v18 = vsub.s32 0, %v1066_v6 }
 0x19c   :  { %984 = vtanh.f32 %v259_v19 }
 0x1a9   :  { %v985_v20 = vpop.eup %984 }
 0x1aa   :  { %v262_v21 = vrot.slane %v985_v20, 1 }
 0x1ac   :  { %933 = vmatmul.mubr.msk.f32.vlgmr.msra.gmra.mxu1 %vm103_vm4, %v262_v21 }
 0x1ad   :  { %943 = vmatpush3.msk.msra.mxu1 %vm107_vm1, %v1029_v2  ;;  %946 = vmatprep.mubr.msk.f32.mxu1 %vm999_vm3, %v998_v0 }
 0x1ae   :  { %944 = vmatprep.subr.mxu1 %v998_v0 }
 0x1af   :  { %945 = vmatpush3.msra.mxu1 %v1034_v3 }
 0x1b0   :  { %956 = vmatprep.subr.mxu1 %v998_v0 }
 0x26c   :  { %v331_v22 = vpop.f32.mrf.mxu1 }
 0x26d   :  { %v336_v23 = vrot.slane %v331_v22, 6 }
 0x26e   :  { %v934_v24 = vpop.f32.mrf.mxu1 }
 0x26f   :  { %v338_v25 = vadd.f32 %v336_v23, %v1071_v10 }
 0x271   :  { %986 = vtanh.f32 %v338_v25 }
 0x27e   :  { %v987_v26 = vpop.eup %986 }
 0x27f   :  { %v341_v27 = vrot.slane %v987_v26, 2 }
 0x281   :  { %940 = vmatmul.mubr.msk.f32.vlgmr.msra.gmra.mxu0 %vm103_vm4, %v341_v27 }
 0x282   :  { %950 = vmatpush3.msk.msra.mxu0 %vm107_vm1, %v1029_v2  ;;  %953 = vmatprep.mubr.msk.f32.mxu0 %vm999_vm3, %v998_v0 }
 0x283   :  { %951 = vmatprep.subr.mxu0 %v998_v0 }
 0x284   :  { %952 = vmatpush3.msra.mxu0 %v1034_v3 }
 0x285   :  { %963 = vmatprep.subr.mxu0 %v998_v0 }
 0x341   :  { %v410_v28 = vpop.f32.mrf.mxu0 }
 0x342   :  { %v415_v29 = vrot.slane %v410_v28, 5 }
 0x343   :  { %v941_v30 = vpop.f32.mrf.mxu0 }
 0x344   :  { %v417_v31 = vadd.f32 %v415_v29, %v1071_v10 }
 0x346   :  { %988 = vtanh.f32 %v417_v31 }
 0x353   :  { %v989_v32 = vpop.eup %988 }
 0x354   :  { %v420_v33 = vrot.slane %v989_v32, 3 }
 0x356   :  { %947 = vmatmul.mubr.msk.f32.vlgmr.msra.gmra.mxu1 %vm103_vm4, %v420_v33 }
 0x357   :  { %957 = vmatpush3.msk.msra.mxu1 %vm107_vm1, %v1029_v2  ;;  %960 = vmatprep.mubr.msk.f32.mxu1 %vm999_vm3, %v998_v0 }
 0x358   :  { %958 = vmatprep.subr.mxu1 %v998_v0 }
 0x359   :  { %959 = vmatpush3.msra.mxu1 %v1034_v3 }
 0x35a   :  { %970 = vmatprep.subr.mxu1 %v998_v0 }
 0x416   :  { %v489_v34 = vpop.f32.mrf.mxu1 }
 0x417   :  { %v494_v35 = vrot.slane %v489_v34, 4 }
 0x418   :  { %v948_v36 = vpop.f32.mrf.mxu1 }
 0x419   :  { %v496_v37 = vadd.f32 %v494_v35, %v1071_v10 }
 0x41b   :  { %990 = vtanh.f32 %v496_v37 }
 0x428   :  { %v991_v38 = vpop.eup %990 }
 0x429   :  { %v499_v39 = vrot.slane %v991_v38, 4 }
 0x42b   :  { %954 = vmatmul.mubr.msk.f32.vlgmr.msra.gmra.mxu0 %vm103_vm4, %v499_v39 }
 0x42c   :  { %964 = vmatpush3.msk.msra.mxu0 %vm107_vm1, %v1029_v2  ;;  %967 = vmatprep.mubr.msk.f32.mxu0 %vm999_vm3, %v998_v0 }
 0x42d   :  { %965 = vmatprep.subr.mxu0 %v998_v0 }
 0x42e   :  { %966 = vmatpush3.msra.mxu0 %v1034_v3  ;;  %v1000_v3 = vmov 9  }
 0x42f   :  { %980 = vset.pattern.permute.xlu1 %v1000_v3  ;;  %981 = vset.pattern.permute.xlu0 %v1000_v3 }
 0x4eb   :  { %v568_v40 = vpop.f32.mrf.mxu0 }
 0x4ec   :  { %v573_v41 = vrot.slane %v568_v40, 3 }
 0x4ed   :  { %v955_v42 = vpop.f32.mrf.mxu0 }
 0x4ee   :  { %v575_v43 = vadd.f32 %v573_v41, %v1071_v10 }
 0x4f0   :  { %992 = vtanh.f32 %v575_v43 }
 0x4fd   :  { %v993_v44 = vpop.eup %992 }
 0x4fe   :  { %v578_v45 = vrot.slane %v993_v44, 5 }
 0x500   :  { %961 = vmatmul.mubr.msk.f32.vlgmr.msra.gmra.mxu1 %vm103_vm4, %v578_v45 }
 0x501   :  { %974 = vmatprep.mubr.msk.f32.mxu1 %vm999_vm3, %v998_v0  ;;  %971 = vmatpush3.msk.msra.mxu1 %vm107_vm1, %v19_v52 }
 0x502   :  { %972 = vmatprep.subr.mxu1 %v998_v0 }
 0x503   :  { %973 = vmatpush3.msra.mxu1 %v18_v53 }
 0x5c0   :  { %v647_v46 = vpop.f32.mrf.mxu1 }
 0x5c1   :  { %v652_v47 = vrot.slane %v647_v46, 2 }
 0x5c2   :  { %v962_v48 = vpop.f32.mrf.mxu1 }
 0x5c3   :  { %v654_v49 = vadd.f32 %v652_v47, %v1071_v10 }
 0x5c5   :  { %994 = vtanh.f32 %v654_v49 }
 0x5d2   :  { %v995_v50 = vpop.eup %994 }
 0x5d3   :  { %v657_v51 = vrot.slane %v995_v50, 6 }
 0x5d5   :  { %968 = vmatmul.mubr.msk.f32.vlgmr.msra.gmra.mxu0 %vm103_vm4, %v657_v51 }
 0x695   :  { %v726_v54 = vpop.f32.mrf.mxu0 }
 0x696   :  { %v731_v55 = vrot.slane %v726_v54, 1 }
 0x697   :  { %v969_v56 = vpop.f32.mrf.mxu0 }
 0x698   :  { %v733_v57 = vadd.f32 %v731_v55, %v1071_v10 }
 0x69a   :  { %996 = vtanh.f32 %v733_v57 }
 0x6a7   :  { %v997_v58 = vpop.eup %996 }
 0x6a8   :  { %v736_v59 = vrot.slane %v997_v58, 7  ;;  %v823_v60 = vrot.slane %v997_v58, %v23_v7 }
 0x6aa   :  { %975 = vmatmul.mubr.msk.f32.vlgmr.msra.gmra.mxu1 %vm103_vm4, %v736_v59  ;;  %v824_v62 = vmul.f32 %v823_v60, %v1029_v2  ;;  %v825_v0 = vmul.f32 %v823_v60, %v17_v61 }
 0x6ac   :  { %v827_v63 = vsel %vm826_vm5, %v824_v62, 0.0  ;;  %v831_v1 = vsel %vm830_vm6, %v825_v0, 0.0 }
 0x6ad   :  { %828 = vadd.xlane.f32.xlu0 %v827_v63 }
 0x6b1   :  { %832 = vadd.xlane.f32.xlu0 %v831_v1 }
 0x736   :  { %v829_v4 = vpop.xlane.xlu0 %828 }
 0x737   :  { %v834_v7 = vadd.f32 %v829_v4, %v1029_v2 }
 0x739   :  { %845 = vperm.xlu1 %980, %v834_v7  }
 0x73a   :  { %v833_v8 = vpop.xlane.xlu0 %832 }
 0x73b   :  { %v835_v9 = vadd.f32 %v833_v8, %v17_v61 }
 0x73d   :  { %849 = vperm.xlu1 %980, %v835_v9  }
 0x76a   :  { %v810_v10 = vpop.f32.mrf.mxu1 }
 0x76b   :  { %v811_v13 = vadd.f32 %v810_v10, %v738_v12 }
 0x76c   :  { %v976_v11 = vpop.f32.mrf.mxu1 }
 0x76d   :  { %v816_v14 = vmax.f32 %v811_v13, 0.0 }
 0x76f   :  { %v818_v16 = vmin.f32 %v816_v14, 1.0 }
 0x771   :  { %v819_v19 = vsel %vm817_vm7, %v818_v16, %v816_v14 }
 0x772   :  { %v842_v22 = vrot.slane %v819_v19, %v841_v18 }
 0x7b4   :  { %v846_v17 = vpop.permute.xlu1 %845 }
 0x7b5   :  { %v851_v21 = vrot.slane %v846_v17, 1 }
 0x7b8   :  { %v850_v20 = vpop.permute.xlu1 %849 }
 0x7b9   :  { %v852_v2 = vrot.slane %v850_v20, 1 }
 0x7bb   :  { %v853_v23 = vsel %vm29_vm0, %v851_v21, %v852_v2 }
 0x7bc   :  { %v855_v24 = vsel %vm838_vm8, %v842_v22, %v853_v23 }
 0x7bd   :  { %856 = vst [vmem:[%s1150_s3] sm:$0xff] %v855_v24 }

</bundles_post_ra>
